<compile_context>
chip_gen: v5e
topology: v5e:2x2
jax: 0.10.0
libtpu: 0.0.40
codegen_flags: <defaults>
</compile_context>

<pallas_src>
import jax
import jax.numpy as jnp
from jax.experimental import pallas as pl
from jax.experimental.pallas import tpu as pltpu


_TILE_S = 256      # slab rows per grid step  (= _TILE_S * R logical rows)
_LANES = 128       # TPU vreg lane width


def _pack_factor(nt: int) -> int:
    """Rows packed per slab row; chosen so packed output width is a multiple
    of 128 lanes (fully dense stores).  nt=8 -> R=16."""
    return _LANES // nt if _LANES % nt == 0 else 16


# ---------------------------------------------------------------------------
# Kernels (operate on lane-dense "slab" tiles)
# ---------------------------------------------------------------------------
def _gnet_mlp_kernel(x_ref, k1_ref, b1_ref, k2_ref, b2_ref, o_ref):
    # x:(Ts, R*C)  k1:(R*C, R*nh)  b1:(1, R*nh)  k2:(R*nh, R*nt)  b2:(1, R*nt)
    h = jnp.dot(x_ref[...], k1_ref[...], preferred_element_type=jnp.float32)
    h = jnp.maximum(h + b1_ref[...], 0.0)                  # fc1 + ReLU
    y = jnp.dot(h, k2_ref[...], preferred_element_type=jnp.float32)
    o_ref[...] = y + b2_ref[...]                           # fc_final


def _gnet_gencode_kernel(x_ref, g_ref, o_ref):
    # x:(Ts, R*C)  g:(R*C, R*nt)  o:(Ts, R*nt)
    o_ref[...] = jnp.dot(x_ref[...], g_ref[...],
                         preferred_element_type=jnp.float32)


# ---------------------------------------------------------------------------
# Layout / wrapper plumbing (metadata only -- no compute hoisted out of kernel)
# ---------------------------------------------------------------------------
def _flatten_like_torch(x):
    """Reproduce: if x.dim() == 3: x = x.reshape(T * B, -1)."""
    if x.ndim == 3:
        T, B, C = x.shape
        x = x.reshape(T * B, C)
    return x


def _to_slab(x, R, tile_s):
    """(N, C) -> zero-padded row-major slab (S, R*C).  Pure layout plumbing:
    the reshape is a metadata op on the contiguous row-major array."""
    N, C = x.shape
    S = max(8, 8 * pl.cdiv(pl.cdiv(N, R), 8))   # slab rows, sublane multiple
    ts = min(tile_s, S)
    S = ts * pl.cdiv(S, ts)                     # make grid evenly divisible
    pad = S * R - N
    if pad:
        x = jnp.pad(x, ((0, pad), (0, 0)))      # zero rows, sliced off later
    return x.reshape(S, R * C), N, S, ts


def _block_diag(w, R):
    """kron(I_R, W): applies W independently to each of the R packed rows."""
    return jnp.kron(jnp.eye(R, dtype=w.dtype), w)


def _compiler_params():
    return pltpu.CompilerParams(
        # Shard row tiles across v7x's two TensorCores (no-op on v5e/v6e).
        dimension_semantics=("parallel",),
        # Explicit scoped-VMEM budget: safe on v5e (16 MiB default) and well
        # inside v7x's 64 MiB physical VMEM.  Actual use per step ~1.7 MiB.
        vmem_limit_bytes=32 * 1024 * 1024,
    )


# ---------------------------------------------------------------------------
# Forward wrappers
# ---------------------------------------------------------------------------
@jax.jit
def gnet_forward_mlp(x, w1, b1, w2, b2):
    """use_g_encode=False branch:  fc_final(relu(fc1(x)))."""
    x = _flatten_like_torch(x).astype(jnp.float32)       # torch x.float()
    C, nh = w1.shape
    nt = w2.shape[1]
    R = _pack_factor(nt)
    x_slab, N, S, ts = _to_slab(x, R, _TILE_S)

    # One-time parameter repacking (constant-folded under jit).
    k1 = _block_diag(w1.astype(jnp.float32), R)                      # (R*C, R*nh)
    k2 = _block_diag(w2.astype(jnp.float32), R)                      # (R*nh, R*nt)
    b1t = jnp.tile(b1.reshape(1, nh).astype(jnp.float32), (1, R))    # (1, R*nh)
    b2t = jnp.tile(b2.reshape(1, nt).astype(jnp.float32), (1, R))    # (1, R*nt)

    out = pl.pallas_call(
        _gnet_mlp_kernel,
        out_shape=jax.ShapeDtypeStruct((S, R * nt), jnp.float32),
        grid=(S // ts,),
        in_specs=[
            pl.BlockSpec((ts, R * C), lambda i: (i, 0)),       # streamed x tiles
            pl.BlockSpec((R * C, R * nh), lambda i: (0, 0)),   # resident weights
            pl.BlockSpec((1, R * nh), lambda i: (0, 0)),
            pl.BlockSpec((R * nh, R * nt), lambda i: (0, 0)),
            pl.BlockSpec((1, R * nt), lambda i: (0, 0)),
        ],
        out_specs=pl.BlockSpec((ts, R * nt), lambda i: (i, 0)),
        compiler_params=_compiler_params(),
    )(x_slab, k1, b1t, k2, b2t)

    # Slab -> logical rows: contiguous row-major metadata reshape, then drop pad.
    return out.reshape(S * R, nt)[:N]


@jax.jit
def gnet_forward_gencode(x, G):
    """use_g_encode=True branch:  x @ G."""
    x = _flatten_like_torch(x).astype(jnp.float32)
    C, nt = G.shape
    R = _pack_factor(nt)
    x_slab, N, S, ts = _to_slab(x, R, _TILE_S)

    kg = _block_diag(G.astype(jnp.float32), R)                       # (R*C, R*nt)

    out = pl.pallas_call(
        _gnet_gencode_kernel,
        out_shape=jax.ShapeDtypeStruct((S, R * nt), jnp.float32),
        grid=(S // ts,),
        in_specs=[
            pl.BlockSpec((ts, R * C), lambda i: (i, 0)),       # streamed x tiles
            pl.BlockSpec((R * C, R * nt), lambda i: (0, 0)),   # resident G
        ],
        out_specs=pl.BlockSpec((ts, R * nt), lambda i: (i, 0)),
        compiler_params=_compiler_params(),
    )(x_slab, kg)

    return out.reshape(S * R, nt)[:N]


# ---------------------------------------------------------------------------
# Main
# ---------------------------------------------------------------------------
if __name__ == "__main__":
    # opt-equivalent hyper-parameters (small, consistent with the module)
    num_domain = 4     # opt.num_domain  (input features)
    nh = 32            # opt.nh          (hidden width of fc1)
    nt = 8             # opt.nt          (output width of fc_final / G)
    T, B = 8, 2        # 3-D input (T, B, C) -> flattened to (T*B, C)

    key = jax.random.PRNGKey(0)
    k_x, k_w1, k_b1, k_w2, k_b2, k_g = jax.random.split(key, 6)

    # Deterministic synthetic parameters, stored as (in, out) so the kernel's
    # x @ W + b matches torch's Linear (x @ W_t.T + b).
    w1 = jax.random.normal(k_w1, (num_domain, nh), jnp.float32) * 0.1
    b1 = jax.random.normal(k_b1, (1, nh), jnp.float32) * 0.1
    w2 = jax.random.normal(k_w2, (nh, nt), jnp.float32) * 0.1
    b2 = jax.random.normal(k_b2, (1, nt), jnp.float32) * 0.1
    G  = jax.random.normal(k_g, (num_domain, nt), jnp.float32)

    # 3-D input (T, B, C) like the recurrent path in the original model.
    x = jax.random.normal(k_x, (T, B, num_domain), jnp.float32)
    x2 = x.reshape(T * B, num_domain)

    # --- use_g_encode = False branch (fc1 -> relu -> fc_final) -------------
    out_mlp = jax.block_until_ready(gnet_forward_mlp(x, w1, b1, w2, b2))
    ref_mlp = jnp.maximum(x2 @ w1 + b1, 0.0) @ w2 + b2
    assert out_mlp.shape == (T * B, nt)
    assert jnp.allclose(out_mlp, ref_mlp, atol=1e-5, rtol=1e-5), \
        float(jnp.max(jnp.abs(out_mlp - ref_mlp)))

    # --- use_g_encode = True branch (x @ G) ---------------------------------
    out_g = jax.block_until_ready(gnet_forward_gencode(x, G))
    ref_g = x2 @ G
    assert out_g.shape == (T * B, nt)
    assert jnp.allclose(out_g, ref_g, atol=1e-5, rtol=1e-5), \
        float(jnp.max(jnp.abs(out_g - ref_g)))

    # TODO(synk): optional bf16 input/weight cast (f32 accumulate) would halve
    # HBM traffic and suit v5e's bf16 MXU, at the cost of ~1e-3 abs error.
    print("KERNEL_OK")
</pallas_src>

<mosaic_0001>
module attributes {stable_mosaic.version = 11 : i64} {
  func.func @_gnet_mlp_kernel(%arg0: i32, %arg1: memref<8x64xf32, #tpu.memory_space<vmem>>, %arg2: memref<64x512xf32, #tpu.memory_space<vmem>>, %arg3: memref<1x512xf32, #tpu.memory_space<vmem>>, %arg4: memref<512x128xf32, #tpu.memory_space<vmem>>, %arg5: memref<1x128xf32, #tpu.memory_space<vmem>>, %arg6: memref<8x128xf32, #tpu.memory_space<vmem>>) attributes {dimension_semantics = [#tpu.dimension_semantics<parallel>], iteration_bounds = array<i64: 1>, scalar_prefetch = 0 : i64, scratch_operands = 0 : i64, tpu.core_type = #tpu.core_type<tc>, window_params = [{transform_indices = @transform_0, window_bounds = array<i64: 8, 64>}, {pipeline_mode = #tpu.pipeline_mode<synchronous>, transform_indices = @transform_1, window_bounds = array<i64: 64, 512>}, {pipeline_mode = #tpu.pipeline_mode<synchronous>, transform_indices = @transform_2, window_bounds = array<i64: 1, 512>}, {pipeline_mode = #tpu.pipeline_mode<synchronous>, transform_indices = @transform_3, window_bounds = array<i64: 512, 128>}, {pipeline_mode = #tpu.pipeline_mode<synchronous>, transform_indices = @transform_4, window_bounds = array<i64: 1, 128>}, {transform_indices = @transform_5, window_bounds = array<i64: 8, 128>}]} {
    %c0 = arith.constant 0 : index
    %c0_0 = arith.constant 0 : index
    %0 = vector.load %arg1[%c0, %c0_0] : memref<8x64xf32, #tpu.memory_space<vmem>>, vector<8x64xf32>
    %c0_1 = arith.constant 0 : index
    %c0_2 = arith.constant 0 : index
    %1 = vector.load %arg2[%c0_1, %c0_2] : memref<64x512xf32, #tpu.memory_space<vmem>>, vector<64x512xf32>
    %cst = arith.constant dense<0.000000e+00> : vector<8x512xf32>
    %2 = tpu.matmul %0, %1, %cst {dimension_numbers = #tpu.dot_dimension_numbers<[1], [0], [0], [1], [0, 0, 1, 1], [], []>} : vector<8x64xf32>, vector<64x512xf32>, vector<8x512xf32> -> vector<8x512xf32>
    %c0_3 = arith.constant 0 : index
    %c0_4 = arith.constant 0 : index
    %3 = vector.load %arg3[%c0_3, %c0_4] : memref<1x512xf32, #tpu.memory_space<vmem>>, vector<1x512xf32>
    %4 = vector.broadcast %3 : vector<1x512xf32> to vector<8x512xf32>
    %5 = arith.addf %2, %4 : vector<8x512xf32>
    %cst_5 = arith.constant 0.000000e+00 : f32
    %6 = vector.broadcast %cst_5 : f32 to vector<8x512xf32>
    %7 = arith.maximumf %5, %6 : vector<8x512xf32>
    %c0_6 = arith.constant 0 : index
    %c0_7 = arith.constant 0 : index
    %8 = vector.load %arg4[%c0_6, %c0_7] : memref<512x128xf32, #tpu.memory_space<vmem>>, vector<512x128xf32>
    %cst_8 = arith.constant dense<0.000000e+00> : vector<8x128xf32>
    %9 = tpu.matmul %7, %8, %cst_8 {dimension_numbers = #tpu.dot_dimension_numbers<[1], [0], [0], [1], [0, 0, 1, 1], [], []>} : vector<8x512xf32>, vector<512x128xf32>, vector<8x128xf32> -> vector<8x128xf32>
    %c0_9 = arith.constant 0 : index
    %c0_10 = arith.constant 0 : index
    %10 = vector.load %arg5[%c0_9, %c0_10] : memref<1x128xf32, #tpu.memory_space<vmem>>, vector<1x128xf32>
    %11 = vector.broadcast %10 : vector<1x128xf32> to vector<8x128xf32>
    %12 = arith.addf %9, %11 : vector<8x128xf32>
    %c0_11 = arith.constant 0 : index
    %c0_12 = arith.constant 0 : index
    %13 = vector.load %arg6[%c0_11, %c0_12] : memref<8x128xf32, #tpu.memory_space<vmem>>, vector<8x128xf32>
    tpu.vector_store %arg6[%c0_11, %c0_12], %12 {strides = array<i32>} : memref<8x128xf32, #tpu.memory_space<vmem>>, vector<8x128xf32>,
    return
  }
  func.func @transform_0(%arg0: i32) -> (i32, i32) {
    %c0_i32 = arith.constant 0 : i32
    %c0_i32_0 = arith.constant 0 : i32
    return %arg0, %c0_i32 : i32, i32
  }
  func.func @transform_1(%arg0: i32) -> (i32, i32) {
    %c0_i32 = arith.constant 0 : i32
    %c0_i32_0 = arith.constant 0 : i32
    %c0_i32_1 = arith.constant 0 : i32
    return %c0_i32, %c0_i32_0 : i32, i32
  }
  func.func @transform_2(%arg0: i32) -> (i32, i32) {
    %c0_i32 = arith.constant 0 : i32
    %c0_i32_0 = arith.constant 0 : i32
    %c0_i32_1 = arith.constant 0 : i32
    return %c0_i32, %c0_i32_0 : i32, i32
  }
  func.func @transform_3(%arg0: i32) -> (i32, i32) {
    %c0_i32 = arith.constant 0 : i32
    %c0_i32_0 = arith.constant 0 : i32
    %c0_i32_1 = arith.constant 0 : i32
    return %c0_i32, %c0_i32_0 : i32, i32
  }
  func.func @transform_4(%arg0: i32) -> (i32, i32) {
    %c0_i32 = arith.constant 0 : i32
    %c0_i32_0 = arith.constant 0 : i32
    %c0_i32_1 = arith.constant 0 : i32
    return %c0_i32, %c0_i32_0 : i32, i32
  }
  func.func @transform_5(%arg0: i32) -> (i32, i32) {
    %c0_i32 = arith.constant 0 : i32
    %c0_i32_0 = arith.constant 0 : i32
    return %arg0, %c0_i32 : i32, i32
  }
}

</mosaic_0001>

<bundles_post_ra>
// kernel: gnet_forward_mlp.1
= control target key start
LH: loop header
LB: loop body
LE: loop exit
PB: predicated region body
PF: predicated region fallthrough
CT: control target
= control target key end

     0   :  { %vm63_vm0 = vcmask 523264   ;;  %s643_s1 = inlined_call_operand.vmem [shape: f32[64,512], index: 1, kind: input, shape index: {}]   ;;  %s644_s0 = inlined_call_operand.vmem [shape: f32[8,64], index: 0, kind: input, shape index: {}]   ;;  %s645_s3 = inlined_call_operand.vmem [shape: f32[512,128], index: 3, kind: input, shape index: {}]   ;;  %s646_s4 = inlined_call_operand.vmem [shape: f32[1,128], index: 4, kind: input, shape index: {}]   ;;  %s647_s2 = inlined_call_operand.vmem [shape: f32[1,512], index: 2, kind: input, shape index: {}]   ;;  %s648_s5 = inlined_call_operand.vmem [shape: f32[8,128], index: 5, kind: output, shape index: {}]  }
   0x1   :  { %v51_v0 = vld [vmem:[%s643_s1 + $0xf0] sm:$0xff]  ;;  %v52_v2 = vld [vmem:[%s643_s1 + $0xf8] sm:$0xff]  ;;  %v49_v6 = vld [vmem:[%s643_s1 + $0xe0] sm:$0xff] }
   0x2   :  { %v47_v1 = vld [vmem:[%s643_s1 + $0xd0] sm:$0xff]  ;;  %115 = vmatpush.msra.mxu2 %v51_v0  ;;  %135 = vmatpush.msra.mxu3 %v52_v2  ;;  %v48_v3 = vld [vmem:[%s643_s1 + $0xd8] sm:$0xff]  ;;  %v45_v7 = vld [vmem:[%s643_s1 + $0xc0] sm:$0xff] }
   0x3   :  { %v43_v4 = vld [vmem:[%s643_s1 + $0xb0] sm:$0xff]  ;;  %v44_v5 = vld [vmem:[%s643_s1 + $0xb8] sm:$0xff]  ;;  %v50_v8 = vld [vmem:[%s643_s1 + $0xe8] sm:$0xff]  ;;  %75 = vmatpush.msra.mxu0 %v49_v6 }
   0x4   :  { %116 = vmatpush.msra.mxu2 %v47_v1  ;;  %136 = vmatpush.msra.mxu3 %v48_v3  ;;  %v39_v9 = vld [vmem:[%s643_s1 + $0x90] sm:$0xff]  ;;  %v40_v10 = vld [vmem:[%s643_s1 + $0x98] sm:$0xff]  ;;  %v41_v11 = vld [vmem:[%s643_s1 + $0xa0] sm:$0xff] }
   0x5   :  { %95 = vmatpush.msra.mxu1 %v50_v8  ;;  %v46_v12 = vld [vmem:[%s643_s1 + $0xc8] sm:$0xff]  ;;  %v35_v13 = vld [vmem:[%s643_s1 + $0x70] sm:$0xff]  ;;  %76 = vmatpush.msra.mxu0 %v45_v7  ;;  %v36_v14 = vld [vmem:[%s643_s1 + $0x78] sm:$0xff] }
   0x6   :  { %117 = vmatpush.msra.mxu2 %v43_v4  ;;  %137 = vmatpush.msra.mxu3 %v44_v5  ;;  %v42_v15 = vld [vmem:[%s643_s1 + $0xa8] sm:$0xff]  ;;  %v37_v16 = vld [vmem:[%s643_s1 + $0x80] sm:$0xff]  ;;  %v31_v17 = vld [vmem:[%s643_s1 + $0x50] sm:$0xff] }
   0x7   :  { %96 = vmatpush.msra.mxu1 %v46_v12  ;;  %77 = vmatpush.msra.mxu0 %v41_v11  ;;  %v32_v18 = vld [vmem:[%s643_s1 + $0x58] sm:$0xff]  ;;  %v38_v19 = vld [vmem:[%s643_s1 + $0x88] sm:$0xff]  ;;  %v33_v20 = vld [vmem:[%s643_s1 + $0x60] sm:$0xff] }
   0x8   :  { %118 = vmatpush.msra.mxu2 %v39_v9  ;;  %138 = vmatpush.msra.mxu3 %v40_v10  ;;  %v34_v21 = vld [vmem:[%s643_s1 + $0x68] sm:$0xff]  ;;  %v27_v22 = vld [vmem:[%s643_s1 + $0x30] sm:$0xff]  ;;  %v28_v23 = vld [vmem:[%s643_s1 + $0x38] sm:$0xff] }
   0x9   :  { %97 = vmatpush.msra.mxu1 %v42_v15  ;;  %78 = vmatpush.msra.mxu0 %v37_v16  ;;  %v29_v24 = vld [vmem:[%s643_s1 + $0x40] sm:$0xff]  ;;  %v30_v25 = vld [vmem:[%s643_s1 + $0x48] sm:$0xff]  ;;  %v23_v26 = vld [vmem:[%s643_s1 + $0x10] sm:$0xff] }
   0xa   :  { %119 = vmatpush.msra.mxu2 %v35_v13  ;;  %139 = vmatpush.msra.mxu3 %v36_v14  ;;  %v24_v27 = vld [vmem:[%s643_s1 + $0x18] sm:$0xff]  ;;  %v20_v28 = vld [vmem:[%s644_s0] sm:$0xff]  ;;  %v26_v30 = vld [vmem:[%s643_s1 + $0x28] sm:$0xff] }
   0xb   :  { %98 = vmatpush.msra.mxu1 %v38_v19  ;;  %79 = vmatpush.msra.mxu0 %v33_v20  ;;  %v25_v29 = vld [vmem:[%s643_s1 + $0x20] sm:$0xff]  ;;  %v198_v31 = vld [vmem:[%s645_s3 + $0x178] sm:$0xff]  ;;  %v22_v34 = vld [vmem:[%s643_s1 + $0x8] sm:$0xff] }
   0xc   :  { %120 = vmatpush.msra.mxu2 %v31_v17  ;;  %140 = vmatpush.msra.mxu3 %v32_v18  ;;  %v214_v32 = vld [vmem:[%s645_s3 + $0x1f8] sm:$0xff]  ;;  %v21_v33 = vld [vmem:[%s643_s1] sm:$0xff]  ;;  %v197_v36 = vld [vmem:[%s645_s3 + $0x170] sm:$0xff] }
   0xd   :  { %99 = vmatpush.msra.mxu1 %v34_v21  ;;  %80 = vmatpush.msra.mxu0 %v29_v24  ;;  %v166_v35 = vld [vmem:[%s645_s3 + $0x78] sm:$0xff]  ;;  %v213_v38 = vld [vmem:[%s645_s3 + $0x1f0] sm:$0xff]  ;;  %v196_v40 = vld [vmem:[%s645_s3 + $0x168] sm:$0xff] }
   0xe   :  { %121 = vmatpush.msra.mxu2 %v27_v22  ;;  %141 = vmatpush.msra.mxu3 %v28_v23  ;;  %v182_v37 = vld [vmem:[%s645_s3 + $0xf8] sm:$0xff]  ;;  %v165_v39 = vld [vmem:[%s645_s3 + $0x70] sm:$0xff]  ;;  %v212_v42 = vld [vmem:[%s645_s3 + $0x1e8] sm:$0xff] }
   0xf   :  { %100 = vmatpush.msra.mxu1 %v30_v25  ;;  %81 = vmatpush.msra.mxu0 %v25_v29  ;;  %v181_v41 = vld [vmem:[%s645_s3 + $0xf0] sm:$0xff]  ;;  %v164_v43 = vld [vmem:[%s645_s3 + $0x68] sm:$0xff]  ;;  %v195_v44 = vld [vmem:[%s645_s3 + $0x160] sm:$0xff] }
  0x10   :  { %122 = vmatpush.msra.mxu2 %v23_v26  ;;  %142 = vmatpush.msra.mxu3 %v24_v27  ;;  %v180_v45 = vld [vmem:[%s645_s3 + $0xe8] sm:$0xff]  ;;  %v211_v46 = vld [vmem:[%s645_s3 + $0x1e0] sm:$0xff]  ;;  %v194_v48 = vld [vmem:[%s645_s3 + $0x158] sm:$0xff] }
  0x11   :  { %306 = vmatmul.msk.f32.vlgmr.msra.gmra.mxu2 %vm63_vm0, %v20_v28  ;;  %307 = vmatmul.msk.f32.vlgmr.msra.gmra.mxu3 %vm63_vm0, %v20_v28  ;;  %v163_v47 = vld [vmem:[%s645_s3 + $0x60] sm:$0xff]  ;;  %v210_v50 = vld [vmem:[%s645_s3 + $0x1d8] sm:$0xff]  ;;  %v193_v52 = vld [vmem:[%s645_s3 + $0x150] sm:$0xff] }
  0x12   :  { %101 = vmatpush.msra.mxu1 %v26_v30  ;;  %259 = vmatpush.msrb.mxu2 %v198_v31  ;;  %v179_v49 = vld [vmem:[%s645_s3 + $0xe0] sm:$0xff]  ;;  %v162_v51 = vld [vmem:[%s645_s3 + $0x58] sm:$0xff]  ;;  %v209_v54 = vld [vmem:[%s645_s3 + $0x1d0] sm:$0xff] }
  0x13   :  { %279 = vmatpush.msrb.mxu3 %v214_v32  ;;  %82 = vmatpush.msra.mxu0 %v21_v33  ;;  %v178_v53 = vld [vmem:[%s645_s3 + $0xd8] sm:$0xff]  ;;  %v161_v55 = vld [vmem:[%s645_s3 + $0x50] sm:$0xff]  ;;  %v192_v56 = vld [vmem:[%s645_s3 + $0x148] sm:$0xff] }
  0x14   :  { %102 = vmatpush.msra.mxu1 %v22_v34  ;;  %304 = vmatmul.msk.f32.vlgmr.msra.gmra.mxu0 %vm63_vm0, %v20_v28  ;;  %v177_v57 = vld [vmem:[%s645_s3 + $0xd0] sm:$0xff]  ;;  %v208_v58 = vld [vmem:[%s645_s3 + $0x1c8] sm:$0xff]  ;;  %v191_v60 = vld [vmem:[%s645_s3 + $0x140] sm:$0xff] }
  0x15   :  { %305 = vmatmul.msk.f32.vlgmr.msra.gmra.mxu1 %vm63_vm0, %v20_v28  ;;  %219 = vmatpush.msrb.mxu0 %v166_v35  ;;  %v160_v59 = vld [vmem:[%s645_s3 + $0x48] sm:$0xff]  ;;  %v207_v62 = vld [vmem:[%s645_s3 + $0x1c0] sm:$0xff]  ;;  %v190_v0 = vld [vmem:[%s645_s3 + $0x138] sm:$0xff] }
  0x16   :  { %260 = vmatpush.msrb.mxu2 %v197_v36  ;;  %239 = vmatpush.msrb.mxu1 %v182_v37  ;;  %v176_v61 = vld [vmem:[%s645_s3 + $0xc8] sm:$0xff]  ;;  %v159_v63 = vld [vmem:[%s645_s3 + $0x40] sm:$0xff]  ;;  %v206_v2 = vld [vmem:[%s645_s3 + $0x1b8] sm:$0xff] }
  0x17   :  { %280 = vmatpush.msrb.mxu3 %v213_v38  ;;  %220 = vmatpush.msrb.mxu0 %v165_v39  ;;  %v175_v1 = vld [vmem:[%s645_s3 + $0xc0] sm:$0xff]  ;;  %v158_v3 = vld [vmem:[%s645_s3 + $0x38] sm:$0xff]  ;;  %v189_v4 = vld [vmem:[%s645_s3 + $0x130] sm:$0xff] }
  0x18   :  { %261 = vmatpush.msrb.mxu2 %v196_v40  ;;  %240 = vmatpush.msrb.mxu1 %v181_v41  ;;  %v174_v5 = vld [vmem:[%s645_s3 + $0xb8] sm:$0xff]  ;;  %v205_v6 = vld [vmem:[%s645_s3 + $0x1b0] sm:$0xff]  ;;  %v188_v8 = vld [vmem:[%s645_s3 + $0x128] sm:$0xff] }
  0x19   :  { %281 = vmatpush.msrb.mxu3 %v212_v42  ;;  %221 = vmatpush.msrb.mxu0 %v164_v43  ;;  %v157_v7 = vld [vmem:[%s645_s3 + $0x30] sm:$0xff]  ;;  %v204_v10 = vld [vmem:[%s645_s3 + $0x1a8] sm:$0xff]  ;;  %v187_v12 = vld [vmem:[%s645_s3 + $0x120] sm:$0xff] }
  0x1a   :  { %262 = vmatpush.msrb.mxu2 %v195_v44  ;;  %241 = vmatpush.msrb.mxu1 %v180_v45  ;;  %v173_v9 = vld [vmem:[%s645_s3 + $0xb0] sm:$0xff]  ;;  %v156_v11 = vld [vmem:[%s645_s3 + $0x28] sm:$0xff]  ;;  %v203_v14 = vld [vmem:[%s645_s3 + $0x1a0] sm:$0xff] }
  0x1b   :  { %282 = vmatpush.msrb.mxu3 %v211_v46  ;;  %222 = vmatpush.msrb.mxu0 %v163_v47  ;;  %v172_v13 = vld [vmem:[%s645_s3 + $0xa8] sm:$0xff]  ;;  %v155_v15 = vld [vmem:[%s645_s3 + $0x20] sm:$0xff]  ;;  %v186_v16 = vld [vmem:[%s645_s3 + $0x118] sm:$0xff] }
  0x1c   :  { %263 = vmatpush.msrb.mxu2 %v194_v48  ;;  %242 = vmatpush.msrb.mxu1 %v179_v49  ;;  %v154_v17 = vld [vmem:[%s645_s3 + $0x18] sm:$0xff]  ;;  %v171_v18 = vld [vmem:[%s645_s3 + $0xa0] sm:$0xff]  ;;  %v185_v19 = vld [vmem:[%s645_s3 + $0x110] sm:$0xff] }
  0x1d   :  { %283 = vmatpush.msrb.mxu3 %v210_v50  ;;  %223 = vmatpush.msrb.mxu0 %v162_v51  ;;  %v202_v20 = vld [vmem:[%s645_s3 + $0x198] sm:$0xff]  ;;  %v153_v21 = vld [vmem:[%s645_s3 + $0x10] sm:$0xff]  ;;  %v184_v23 = vld [vmem:[%s645_s3 + $0x108] sm:$0xff] }
  0x1e   :  { %264 = vmatpush.msrb.mxu2 %v193_v52  ;;  %243 = vmatpush.msrb.mxu1 %v178_v53  ;;  %v170_v22 = vld [vmem:[%s645_s3 + $0x98] sm:$0xff]  ;;  %v201_v24 = vld [vmem:[%s645_s3 + $0x190] sm:$0xff]  ;;  %v152_v25 = vld [vmem:[%s645_s3 + $0x8] sm:$0xff] }
  0x1f   :  { %284 = vmatpush.msrb.mxu3 %v209_v54  ;;  %224 = vmatpush.msrb.mxu0 %v161_v55  ;;  %v169_v26 = vld [vmem:[%s645_s3 + $0x90] sm:$0xff]  ;;  %v183_v27 = vld [vmem:[%s645_s3 + $0x100] sm:$0xff]  ;;  %v200_v28 = vld [vmem:[%s645_s3 + $0x188] sm:$0xff] }
  0x20   :  { %265 = vmatpush.msrb.mxu2 %v192_v56  ;;  %244 = vmatpush.msrb.mxu1 %v177_v57  ;;  %v151_v29 = vld [vmem:[%s645_s3] sm:$0xff]  ;;  %v168_v30 = vld [vmem:[%s645_s3 + $0x88] sm:$0xff] }
  0x21   :  { %285 = vmatpush.msrb.mxu3 %v208_v58  ;;  %225 = vmatpush.msrb.mxu0 %v160_v59  ;;  %v199_v31 = vld [vmem:[%s645_s3 + $0x180] sm:$0xff] }
  0x22   :  { %266 = vmatpush.msrb.mxu2 %v191_v60  ;;  %245 = vmatpush.msrb.mxu1 %v176_v61  ;;  %v167_v32 = vld [vmem:[%s645_s3 + $0x80] sm:$0xff] }
  0x23   :  { %286 = vmatpush.msrb.mxu3 %v207_v62  ;;  %226 = vmatpush.msrb.mxu0 %v159_v63  ;;  %v53_v33 = vld [vmem:[%s647_s2] sm:$0xf] }
  0x24   :  { %267 = vmatpush.msrb.mxu2 %v190_v0  ;;  %246 = vmatpush.msrb.mxu1 %v175_v1  ;;  %v55_v34 = vperm.slane %v53_v33, 0  ;;  %v56_v35 = vperm.slane %v53_v33, 1  ;;  %v57_v36 = vperm.slane %v53_v33, 2  ;;  %v58_v37 = vperm.slane %v53_v33, 3  ;;  %v308_v50 = vld [vmem:[%s646_s4] ss:$0 sm:$0xff] }
  0x25   :  { %287 = vmatpush.msrb.mxu3 %v206_v2  ;;  %227 = vmatpush.msrb.mxu0 %v158_v3 }
  0x26   :  { %268 = vmatpush.msrb.mxu2 %v189_v4  ;;  %247 = vmatpush.msrb.mxu1 %v174_v5 }
  0x27   :  { %288 = vmatpush.msrb.mxu3 %v205_v6  ;;  %228 = vmatpush.msrb.mxu0 %v157_v7 }
  0x28   :  { %269 = vmatpush.msrb.mxu2 %v188_v8  ;;  %248 = vmatpush.msrb.mxu1 %v173_v9 }
  0x29   :  { %289 = vmatpush.msrb.mxu3 %v204_v10  ;;  %229 = vmatpush.msrb.mxu0 %v156_v11 }
  0x2a   :  { %270 = vmatpush.msrb.mxu2 %v187_v12  ;;  %249 = vmatpush.msrb.mxu1 %v172_v13 }
  0x2b   :  { %290 = vmatpush.msrb.mxu3 %v203_v14  ;;  %230 = vmatpush.msrb.mxu0 %v155_v15 }
  0x2c   :  { %271 = vmatpush.msrb.mxu2 %v186_v16  ;;  %250 = vmatpush.msrb.mxu1 %v171_v18 }
  0x2d   :  { %231 = vmatpush.msrb.mxu0 %v154_v17  ;;  %291 = vmatpush.msrb.mxu3 %v202_v20 }
  0x2e   :  { %272 = vmatpush.msrb.mxu2 %v185_v19  ;;  %251 = vmatpush.msrb.mxu1 %v170_v22 }
  0x2f   :  { %232 = vmatpush.msrb.mxu0 %v153_v21  ;;  %292 = vmatpush.msrb.mxu3 %v201_v24 }
  0x30   :  { %273 = vmatpush.msrb.mxu2 %v184_v23  ;;  %252 = vmatpush.msrb.mxu1 %v169_v26 }
  0x31   :  { %233 = vmatpush.msrb.mxu0 %v152_v25  ;;  %293 = vmatpush.msrb.mxu3 %v200_v28 }
  0x32   :  { %274 = vmatpush.msrb.mxu2 %v183_v27  ;;  %253 = vmatpush.msrb.mxu1 %v168_v30 }
  0x33   :  { %234 = vmatpush.msrb.mxu0 %v151_v29  ;;  %294 = vmatpush.msrb.mxu3 %v199_v31 }
  0x34   :  { %254 = vmatpush.msrb.mxu1 %v167_v32 }
  0x91   :  { %v84_v38 = vpop.f32.mrf.mxu0 }
  0x92   :  { %v104_v39 = vpop.f32.mrf.mxu1  ;;  %v85_v40 = vadd.f32 %v84_v38, %v55_v34 }
  0x93   :  { %v105_v41 = vadd.f32 %v104_v39, %v56_v35 }
  0x94   :  { %v124_v42 = vpop.f32.mrf.mxu2  ;;  %v144_v43 = vpop.f32.mrf.mxu3  ;;  %v147_v45 = vmax.f32 %v85_v40, 0.0 }
  0x95   :  { %v125_v44 = vadd.f32 %v124_v42, %v57_v36  ;;  %v145_v46 = vadd.f32 %v144_v43, %v58_v37  ;;  %v148_v47 = vmax.f32 %v105_v41, 0.0 }
  0x96   :  { %235 = vmatmul.f32.vlgmr.msrb.gmra.mxu0 %v147_v45 }
  0x97   :  { %v149_v48 = vmax.f32 %v125_v44, 0.0  ;;  %v150_v49 = vmax.f32 %v145_v46, 0.0  ;;  %255 = vmatmul.f32.vlgmr.msrb.gmra.mxu1 %v148_v47 }
  0x99   :  { %275 = vmatmul.f32.vlgmr.msrb.gmra.mxu2 %v149_v48  ;;  %295 = vmatmul.f32.vlgmr.msrb.gmra.mxu3 %v150_v49 }
 0x113   :  { %v236_v51 = vpop.f32.mrf.mxu0 }
 0x114   :  { %v237_v52 = vadd.f32 %v308_v50, %v236_v51  ;;  %v256_v53 = vpop.f32.mrf.mxu1 }
 0x116   :  { %v257_v54 = vadd.f32 %v256_v53, %v237_v52 }
 0x11c   :  { %v276_v55 = vpop.f32.mrf.mxu2  ;;  %v296_v56 = vpop.f32.mrf.mxu3 }
 0x11d   :  { %v277_v57 = vadd.f32 %v276_v55, %v257_v54 }
 0x11f   :  { %v297_v58 = vadd.f32 %v296_v56, %v277_v57 }
 0x121   :  { %299 = vst [vmem:[%s648_s5] sm:$0xff] %v297_v58 }

</bundles_post_ra>
